<compile_context>
chip_gen: v7x
topology: tpu7x:2x2x1
jax: 0.10.0
libtpu: 0.0.40
codegen_flags: <defaults>
</compile_context>

<pallas_src>
import functools

import jax
import jax.numpy as jnp
from jax.experimental import pallas as pl
from jax.experimental.pallas import tpu as pltpu

EPS = 1e-5
LANE = 128                      # TPU lane width: channel dims padded to multiples of this
VMEM_LIMIT = 48 * 1024 * 1024   # fits v7x's 64 MiB physical VMEM with headroom


def _round_up(x, m):
    return (x + m - 1) // m * m


# ----------------------------- Pallas kernels -------------------------------

def _matmul_bn_act_kernel(x_ref, w_ref, s_ref, b_ref, o_ref, *, relu):
    # x: (TM, Cin) bf16, w: (Cin, Cout) bf16, s/b: (1, Cout) f32 folded BatchNorm.
    y = jnp.dot(x_ref[...], w_ref[...], preferred_element_type=jnp.float32)
    y = y * s_ref[...] + b_ref[...]
    if relu:
        y = jnp.maximum(y, 0.0)
    o_ref[...] = y.astype(o_ref.dtype)


def _matmul_bn_add_relu_kernel(x_ref, w_ref, s_ref, b_ref, r_ref, o_ref):
    # conv3 (1x1) + BN + identity-residual add + ReLU, fused.
    y = jnp.dot(x_ref[...], w_ref[...], preferred_element_type=jnp.float32)
    y = y * s_ref[...] + b_ref[...] + r_ref[...].astype(jnp.float32)
    o_ref[...] = jnp.maximum(y, 0.0).astype(o_ref.dtype)


def _matmul_bn_proj_add_relu_kernel(x_ref, w_ref, s_ref, b_ref,
                                    xs_ref, ws_ref, ss_ref, bs_ref, o_ref):
    # conv3 (1x1) + BN fused with the shortcut 1x1 projection + BN + add + ReLU.
    y = jnp.dot(x_ref[...], w_ref[...], preferred_element_type=jnp.float32)
    y = y * s_ref[...] + b_ref[...]
    sc = jnp.dot(xs_ref[...], ws_ref[...], preferred_element_type=jnp.float32)
    sc = sc * ss_ref[...] + bs_ref[...]
    o_ref[...] = jnp.maximum(y + sc, 0.0).astype(o_ref.dtype)


def _conv3x3_bn_relu_kernel(xq_ref, w_ref, s_ref, b_ref, o_ref, acc_ref, *,
                            stride, hq):
    # xq_ref: (1, stride*stride*Hq, Wq, Cin) parity-plane view of the zero-padded
    #         input; plane p=(dy%s)*s+(dx%s) holds xpad[dy%s::s, dx%s::s].
    # o_ref : (1, TH, Wo, Cout) -- strided conv output rows [rb*TH, rb*TH + TH).
    _, th, wo, cout = o_ref.shape
    cin = xq_ref.shape[-1]
    row0 = pl.multiple_of(pl.program_id(1) * th, th)
    acc_ref[...] = jnp.zeros_like(acc_ref)
    for dy in range(3):
        for dx in range(3):
            plane = (dy % stride) * stride + (dx % stride)
            r_off = plane * hq + dy // stride          # static plane offset + halo row
            c_off = dx // stride                       # static halo column
            patch = xq_ref[0, pl.ds(row0 + r_off, th), c_off:c_off + wo, :]
            acc_ref[...] += jnp.dot(patch.reshape(th * wo, cin), w_ref[dy, dx],
                                    preferred_element_type=jnp.float32)
    y = acc_ref[...] * s_ref[...] + b_ref[...]
    o_ref[...] = jnp.maximum(y, 0.0).reshape(1, th, wo, cout).astype(o_ref.dtype)


# ------------------------------- wrappers ------------------------------------

def _tile_rows(m, block_rows):
    tm = min(block_rows, _round_up(m, 16))
    return tm, _round_up(m, tm)


def _pad_rows(a, mp):
    return a if a.shape[0] == mp else jnp.pad(a, ((0, mp - a.shape[0]), (0, 0)))


def _matmul_bn_act(x2d, w, scale, bias, *, relu, block_rows, out_dtype):
    m, cin = x2d.shape
    cout = w.shape[1]
    tm, mp = _tile_rows(m, block_rows)
    x2d = _pad_rows(x2d, mp)
    out = pl.pallas_call(
        functools.partial(_matmul_bn_act_kernel, relu=relu),
        out_shape=jax.ShapeDtypeStruct((mp, cout), out_dtype),
        grid=(mp // tm,),
        in_specs=[
            pl.BlockSpec((tm, cin), lambda i: (i, 0)),
            pl.BlockSpec((cin, cout), lambda i: (0, 0)),
            pl.BlockSpec((1, cout), lambda i: (0, 0)),
            pl.BlockSpec((1, cout), lambda i: (0, 0)),
        ],
        out_specs=pl.BlockSpec((tm, cout), lambda i: (i, 0)),
        compiler_params=pltpu.CompilerParams(
            dimension_semantics=("parallel",), vmem_limit_bytes=VMEM_LIMIT),
    )(x2d, w, scale, bias)
    return out[:m]


def _matmul_bn_add_relu(x2d, w, scale, bias, r2d, *, block_rows):
    m, cin = x2d.shape
    cout = w.shape[1]
    tm, mp = _tile_rows(m, block_rows)
    x2d, r2d = _pad_rows(x2d, mp), _pad_rows(r2d, mp)
    out = pl.pallas_call(
        _matmul_bn_add_relu_kernel,
        out_shape=jax.ShapeDtypeStruct((mp, cout), jnp.float32),
        grid=(mp // tm,),
        in_specs=[
            pl.BlockSpec((tm, cin), lambda i: (i, 0)),
            pl.BlockSpec((cin, cout), lambda i: (0, 0)),
            pl.BlockSpec((1, cout), lambda i: (0, 0)),
            pl.BlockSpec((1, cout), lambda i: (0, 0)),
            pl.BlockSpec((tm, cout), lambda i: (i, 0)),
        ],
        out_specs=pl.BlockSpec((tm, cout), lambda i: (i, 0)),
        compiler_params=pltpu.CompilerParams(
            dimension_semantics=("parallel",), vmem_limit_bytes=VMEM_LIMIT),
    )(x2d, w, scale, bias, r2d)
    return out[:m]


def _matmul_bn_proj_add_relu(x2d, w, scale, bias, xs2d, ws, ss, bs, *, block_rows):
    m, cin = x2d.shape
    cout = w.shape[1]
    cin_s = xs2d.shape[1]
    tm, mp = _tile_rows(m, block_rows)
    x2d, xs2d = _pad_rows(x2d, mp), _pad_rows(xs2d, mp)
    out = pl.pallas_call(
        _matmul_bn_proj_add_relu_kernel,
        out_shape=jax.ShapeDtypeStruct((mp, cout), jnp.float32),
        grid=(mp // tm,),
        in_specs=[
            pl.BlockSpec((tm, cin), lambda i: (i, 0)),
            pl.BlockSpec((cin, cout), lambda i: (0, 0)),
            pl.BlockSpec((1, cout), lambda i: (0, 0)),
            pl.BlockSpec((1, cout), lambda i: (0, 0)),
            pl.BlockSpec((tm, cin_s), lambda i: (i, 0)),
            pl.BlockSpec((cin_s, cout), lambda i: (0, 0)),
            pl.BlockSpec((1, cout), lambda i: (0, 0)),
            pl.BlockSpec((1, cout), lambda i: (0, 0)),
        ],
        out_specs=pl.BlockSpec((tm, cout), lambda i: (i, 0)),
        compiler_params=pltpu.CompilerParams(
            dimension_semantics=("parallel",), vmem_limit_bytes=VMEM_LIMIT),
    )(x2d, w, scale, bias, xs2d, ws, ss, bs)
    return out[:m]


def _conv3x3_bn_relu(x_nhwc, w, scale, bias, *, stride, row_block):
    n, h, wd, cin = x_nhwc.shape
    cout = w.shape[3]
    assert h % stride == 0 and wd % stride == 0
    ho, wo = h // stride, wd // stride
    halo = 2 // stride
    hq, wq = ho + halo, wo + halo

    # Zero-pad (conv padding=1) and decompose into stride x stride parity planes so
    # the kernel computes the strided output directly from contiguous slices.
    xp = jnp.pad(x_nhwc, ((0, 0), (1, 1), (1, 1), (0, 0)))
    planes = []
    for py in range(stride):
        for px in range(stride):
            p = xp[:, py::stride, px::stride, :][:, :hq, :wq, :]
            ph, pw = hq - p.shape[1], wq - p.shape[2]
            if ph or pw:
                p = jnp.pad(p, ((0, 0), (0, ph), (0, pw), (0, 0)))
            planes.append(p)
    xq = jnp.stack(planes, axis=1).reshape(n, stride * stride * hq, wq, cin)

    th = row_block if (0 < row_block <= ho and ho % row_block == 0) else ho
    return pl.pallas_call(
        functools.partial(_conv3x3_bn_relu_kernel, stride=stride, hq=hq),
        out_shape=jax.ShapeDtypeStruct((n, ho, wo, cout), jnp.bfloat16),
        grid=(n, ho // th),
        in_specs=[
            pl.BlockSpec((1, stride * stride * hq, wq, cin), lambda b, r: (b, 0, 0, 0)),
            pl.BlockSpec((3, 3, cin, cout), lambda b, r: (0, 0, 0, 0)),
            pl.BlockSpec((1, cout), lambda b, r: (0, 0)),
            pl.BlockSpec((1, cout), lambda b, r: (0, 0)),
        ],
        out_specs=pl.BlockSpec((1, th, wo, cout), lambda b, r: (b, r, 0, 0)),
        scratch_shapes=[pltpu.VMEM((th * wo, cout), jnp.float32)],
        compiler_params=pltpu.CompilerParams(
            dimension_semantics=("parallel", "parallel"),
            vmem_limit_bytes=VMEM_LIMIT),
    )(xq, w, scale, bias)


# ----------------------------- Bottleneck model ------------------------------

def _bn_fold(gamma, beta, mean, var, eps=EPS):
    scale = gamma / jnp.sqrt(var + eps)
    bias = beta - mean * scale
    return scale.reshape(1, -1), bias.reshape(1, -1)


def _pad2(a, rows, cols):
    return jnp.pad(a, ((0, rows - a.shape[0]), (0, cols - a.shape[1])))


def make_params(key, cin, out, stride, expand=4):
    mid = out // expand
    ks = jax.random.split(key, 9)

    def bn_params(k, c):
        k1, k2, k3, k4 = jax.random.split(k, 4)
        gamma = 1.0 + 0.1 * jax.random.normal(k1, (c,), jnp.float32)
        beta = 0.1 * jax.random.normal(k2, (c,), jnp.float32)
        mean = 0.1 * jax.random.normal(k3, (c,), jnp.float32)
        var = jax.random.uniform(k4, (c,), jnp.float32, 0.5, 1.5)
        return gamma, beta, mean, var

    # PyTorch OIHW conv weights (deterministic synthetic init).
    w1 = 0.2 * jax.random.normal(ks[0], (mid, cin, 1, 1), jnp.float32)
    w2 = 0.2 * jax.random.normal(ks[1], (mid, mid, 3, 3), jnp.float32)
    w3 = 0.2 * jax.random.normal(ks[2], (out, mid, 1, 1), jnp.float32)
    bn1, bn2, bn3 = bn_params(ks[3], mid), bn_params(ks[4], mid), bn_params(ks[5], out)

    has_proj = not (cin == out and stride == 1)
    ws = 0.2 * jax.random.normal(ks[6], (out, cin, 1, 1), jnp.float32) if has_proj else None
    bns = bn_params(ks[7], out) if has_proj else None

    torch_params = dict(w1=w1, w2=w2, w3=w3, ws=ws, bn1=bn1, bn2=bn2, bn3=bn3, bns=bns)

    # Kernel-layout params: channel dims zero-padded to the 128 lane width, matmul
    # operands in bf16 (f32 accumulation in-kernel), BN folded to f32 scale/bias
    # (zero-padded so padded channels stay exactly zero).
    cin_p, mid_p, out_p = (_round_up(c, LANE) for c in (cin, mid, out))
    s1, b1 = _bn_fold(*bn1)
    s2, b2 = _bn_fold(*bn2)
    s3, b3 = _bn_fold(*bn3)
    kernel_params = dict(
        w1=_pad2(jnp.transpose(w1[:, :, 0, 0], (1, 0)), cin_p, mid_p).astype(jnp.bfloat16),
        w2=jnp.pad(jnp.transpose(w2, (2, 3, 1, 0)),
                   ((0, 0), (0, 0), (0, mid_p - mid), (0, mid_p - mid))).astype(jnp.bfloat16),
        w3=_pad2(jnp.transpose(w3[:, :, 0, 0], (1, 0)), mid_p, out_p).astype(jnp.bfloat16),
        s1=_pad2(s1, 1, mid_p), b1=_pad2(b1, 1, mid_p),
        s2=_pad2(s2, 1, mid_p), b2=_pad2(b2, 1, mid_p),
        s3=_pad2(s3, 1, out_p), b3=_pad2(b3, 1, out_p),
        ws=None, ss=None, bs=None,
        out_ch=out,
    )
    if has_proj:
        ss, bs = _bn_fold(*bns)
        kernel_params.update(
            ws=_pad2(jnp.transpose(ws[:, :, 0, 0], (1, 0)), cin_p, out_p).astype(jnp.bfloat16),
            ss=_pad2(ss, 1, out_p), bs=_pad2(bs, 1, out_p))
    return torch_params, kernel_params


def bottleneck_forward(x_nchw, kp, stride, *, block_rows=256, row_block=4):
    """Pallas Bottleneck forward.  x_nchw: (N, Cin, H, W) f32 -> (N, Cout, Ho, Wo) f32."""
    x = jnp.transpose(x_nchw, (0, 2, 3, 1)).astype(jnp.float32)   # NHWC
    n, h, wd, cin = x.shape
    cin_p, mid_p = kp["w1"].shape
    out_p = kp["w3"].shape[1]
    out_ch = kp["out_ch"]

    # Channel-pad to lane width once at the boundary; bf16 matmul operands.
    if cin_p > cin:
        x = jnp.pad(x, ((0, 0), (0, 0), (0, 0), (0, cin_p - cin)))
    x = x.astype(jnp.bfloat16)

    # conv1: 1x1 + BN + ReLU (row-tiled matmul)
    y = _matmul_bn_act(x.reshape(n * h * wd, cin_p), kp["w1"], kp["s1"], kp["b1"],
                       relu=True, block_rows=block_rows, out_dtype=jnp.bfloat16)
    y = y.reshape(n, h, wd, mid_p)

    # conv2: 3x3 / stride / pad 1 + BN + ReLU, strided output computed directly
    y = _conv3x3_bn_relu(y, kp["w2"], kp["s2"], kp["b2"], stride=stride,
                         row_block=row_block)
    ho, wo = y.shape[1], y.shape[2]

    # conv3: 1x1 + BN fused with shortcut (identity or 1x1 projection) + add + ReLU
    y2d = y.reshape(n * ho * wo, mid_p)
    if kp["ws"] is None:
        res = x.reshape(n * ho * wo, out_p)            # identity: cin==out, stride==1
        out = _matmul_bn_add_relu(y2d, kp["w3"], kp["s3"], kp["b3"], res,
                                  block_rows=block_rows)
    else:
        xs = x[:, ::stride, ::stride, :].reshape(n * ho * wo, cin_p)
        out = _matmul_bn_proj_add_relu(y2d, kp["w3"], kp["s3"], kp["b3"],
                                       xs, kp["ws"], kp["ss"], kp["bs"],
                                       block_rows=block_rows)
    out = out.reshape(n, ho, wo, out_p)[..., :out_ch]
    return jnp.transpose(out, (0, 3, 1, 2))            # back to NCHW


# ------------------------------- reference -----------------------------------

def bottleneck_reference(x, tp, stride, eps=EPS):
    """Pure-JAX NCHW reference mirroring the PyTorch module (eval-mode BN)."""
    def cba(x, w, bn, s, pad, relu):
        y = jax.lax.conv_general_dilated(
            x, w, (s, s), [(pad, pad), (pad, pad)],
            dimension_numbers=("NCHW", "OIHW", "NCHW"))
        gamma, beta, mean, var = bn
        scale = gamma / jnp.sqrt(var + eps)
        bias = beta - mean * scale
        y = y * scale[None, :, None, None] + bias[None, :, None, None]
        return jnp.maximum(y, 0.0) if relu else y

    y = cba(x, tp["w1"], tp["bn1"], 1, 0, True)
    y = cba(y, tp["w2"], tp["bn2"], stride, 1, True)
    y = cba(y, tp["w3"], tp["bn3"], 1, 0, False)
    sc = x if tp["ws"] is None else cba(x, tp["ws"], tp["bns"], stride, 0, False)
    return jnp.maximum(y + sc, 0.0)


# --------------------------------- main ---------------------------------------

if __name__ == "__main__":
    # Tolerance sized for bf16 MXU operands (f32 accumulation) vs a pure-f32 reference.
    TOL = 8e-2
    key = jax.random.PRNGKey(0)

    configs = [
        # (N, CIN, H, W, OUT, STRIDE)
        (2, 8, 16, 16, 16, 2),    # projection shortcut, stride 2
        (2, 16, 16, 16, 16, 1),   # identity shortcut, stride 1
    ]
    for idx, (n, cin, h, w, out_ch, stride) in enumerate(configs):
        kx, kp_key, key = jax.random.split(key, 3)
        x = jax.random.normal(kx, (n, cin, h, w), jnp.float32)
        torch_params, kernel_params = make_params(kp_key, cin, out_ch, stride)

        got = jax.block_until_ready(bottleneck_forward(x, kernel_params, stride))
        ref = jax.block_until_ready(bottleneck_reference(x, torch_params, stride))

        assert got.shape == (n, out_ch, h // stride, w // stride), got.shape
        max_err = float(jnp.max(jnp.abs(got - ref)))
        assert max_err < TOL, f"config {idx}: max abs error {max_err}"
    print("KERNEL_OK")
</pallas_src>

<mosaic_0001>
module attributes {stable_mosaic.version = 11 : i64} {
  func.func @_matmul_bn_act_kernel(%arg0: i32, %arg1: memref<256x128xbf16, #tpu.memory_space<vmem>>, %arg2: memref<128x128xbf16, #tpu.memory_space<vmem>>, %arg3: memref<1x128xf32, #tpu.memory_space<vmem>>, %arg4: memref<1x128xf32, #tpu.memory_space<vmem>>, %arg5: memref<256x128xbf16, #tpu.memory_space<vmem>>) attributes {dimension_semantics = [#tpu.dimension_semantics<parallel>], iteration_bounds = array<i64: 2>, scalar_prefetch = 0 : i64, scratch_operands = 0 : i64, tpu.core_type = #tpu.core_type<tc>, window_params = [{transform_indices = @transform_0, window_bounds = array<i64: 256, 128>}, {pipeline_mode = #tpu.pipeline_mode<synchronous>, transform_indices = @transform_1, window_bounds = array<i64: 128, 128>}, {pipeline_mode = #tpu.pipeline_mode<synchronous>, transform_indices = @transform_2, window_bounds = array<i64: 1, 128>}, {pipeline_mode = #tpu.pipeline_mode<synchronous>, transform_indices = @transform_3, window_bounds = array<i64: 1, 128>}, {transform_indices = @transform_4, window_bounds = array<i64: 256, 128>}]} {
    %c0 = arith.constant 0 : index
    %c0_0 = arith.constant 0 : index
    %0 = vector.load %arg1[%c0, %c0_0] : memref<256x128xbf16, #tpu.memory_space<vmem>>, vector<256x128xbf16>
    %c0_1 = arith.constant 0 : index
    %c0_2 = arith.constant 0 : index
    %1 = vector.load %arg2[%c0_1, %c0_2] : memref<128x128xbf16, #tpu.memory_space<vmem>>, vector<128x128xbf16>
    %cst = arith.constant dense<0.000000e+00> : vector<256x128xf32>
    %2 = tpu.matmul %0, %1, %cst {dimension_numbers = #tpu.dot_dimension_numbers<[1], [0], [0], [1], [0, 0, 1, 1], [], []>} : vector<256x128xbf16>, vector<128x128xbf16>, vector<256x128xf32> -> vector<256x128xf32>
    %c0_3 = arith.constant 0 : index
    %c0_4 = arith.constant 0 : index
    %3 = vector.load %arg3[%c0_3, %c0_4] : memref<1x128xf32, #tpu.memory_space<vmem>>, vector<1x128xf32>
    %4 = vector.broadcast %3 : vector<1x128xf32> to vector<256x128xf32>
    %5 = arith.mulf %2, %4 : vector<256x128xf32>
    %c0_5 = arith.constant 0 : index
    %c0_6 = arith.constant 0 : index
    %6 = vector.load %arg4[%c0_5, %c0_6] : memref<1x128xf32, #tpu.memory_space<vmem>>, vector<1x128xf32>
    %7 = vector.broadcast %6 : vector<1x128xf32> to vector<256x128xf32>
    %8 = arith.addf %5, %7 : vector<256x128xf32>
    %cst_7 = arith.constant 0.000000e+00 : f32
    %9 = vector.broadcast %cst_7 : f32 to vector<256x128xf32>
    %10 = arith.maximumf %8, %9 : vector<256x128xf32>
    %11 = arith.truncf %10 : vector<256x128xf32> to vector<256x128xbf16>
    %c0_8 = arith.constant 0 : index
    %c0_9 = arith.constant 0 : index
    %12 = vector.load %arg5[%c0_8, %c0_9] : memref<256x128xbf16, #tpu.memory_space<vmem>>, vector<256x128xbf16>
    tpu.vector_store %arg5[%c0_8, %c0_9], %11 {strides = array<i32>} : memref<256x128xbf16, #tpu.memory_space<vmem>>, vector<256x128xbf16>,
    return
  }
  func.func @transform_0(%arg0: i32) -> (i32, i32) {
    %c0_i32 = arith.constant 0 : i32
    %c0_i32_0 = arith.constant 0 : i32
    return %arg0, %c0_i32 : i32, i32
  }
  func.func @transform_1(%arg0: i32) -> (i32, i32) {
    %c0_i32 = arith.constant 0 : i32
    %c0_i32_0 = arith.constant 0 : i32
    %c0_i32_1 = arith.constant 0 : i32
    return %c0_i32, %c0_i32_0 : i32, i32
  }
  func.func @transform_2(%arg0: i32) -> (i32, i32) {
    %c0_i32 = arith.constant 0 : i32
    %c0_i32_0 = arith.constant 0 : i32
    %c0_i32_1 = arith.constant 0 : i32
    return %c0_i32, %c0_i32_0 : i32, i32
  }
  func.func @transform_3(%arg0: i32) -> (i32, i32) {
    %c0_i32 = arith.constant 0 : i32
    %c0_i32_0 = arith.constant 0 : i32
    %c0_i32_1 = arith.constant 0 : i32
    return %c0_i32, %c0_i32_0 : i32, i32
  }
  func.func @transform_4(%arg0: i32) -> (i32, i32) {
    %c0_i32 = arith.constant 0 : i32
    %c0_i32_0 = arith.constant 0 : i32
    return %arg0, %c0_i32 : i32, i32
  }
}

</mosaic_0001>

<bundles_post_ra>
// kernel: tpu_custom_call.1
= control target key start
LH: loop header
LB: loop body
LE: loop exit
PB: predicated region body
PF: predicated region fallthrough
CT: control target
= control target key end

     0   :  { %9 = vsyncpa [#allocation3], 0  ;;  %s1814_s0 = inlined_call_operand.hbm [shape: bf16[512,128], index: 0, kind: input, shape index: {}]   ;;  %s1815_s1 = inlined_call_operand.hbm [shape: bf16[128,128], index: 1, kind: input, shape index: {}]   ;;  %s1816_s2 = inlined_call_operand.vmem [shape: f32[1,128], index: 2, kind: input, shape index: {}]   ;;  %s1817_s3 = inlined_call_operand.vmem [shape: f32[1,128], index: 3, kind: input, shape index: {}]   ;;  %s1818_s4 = inlined_call_operand.hbm [shape: bf16[512,128], index: 4, kind: output, shape index: {}]  }
   0x1   :  { %11 = vsyncpa [#allocation3 + $0x1], 0 }
   0x2   :  { %12 = vsyncpa [#allocation6], 0 }
   0x3   :  { %13 = vsyncpa [#allocation4], 0 }
   0x4   :  { %15 = vsyncpa [#allocation4 + $0x1], 0  ;;  %s1492_s15 = smov 0   ;;  %s1494_s16 = smov 0  }
   0x5   :  { %s1496_s17 = smov 0   ;;  %s1498_s18 = smov 0  }
   0x6 LB: > { %s1513_s19 = sadd.s32 4294967295, %s1458_s18   ;;  %s954_s20 = sadd.s32 4294967294, %s1458_s18   ;;  %s1458_s18 = sphi %s1498_s18, %s1838_s18   ;;  %s1454_s17 = sphi %s1496_s17, %s1837_s17   ;;  %s1450_s16 = sphi %s1494_s16, %s1836_s16   ;;  %s1446_s15 = sphi %s1492_s15, %s1835_s15  }
   0x7   : > { %p41_p0 = scmp.ne.s32.totalorder %s1450_s16, %s1446_s15  ;;  %p1819_p1 = scmp.eq.s32.totalorder %s1513_s19, 0 }
   0x8   : > { %p134_p3 = scmp.eq.s32.totalorder %s954_s20, 1  ;;  %p955_p5 = scmp.ge.s32.totalorder %s1458_s18, 1 }
   0x9   : > { %p1522_p4 = por %p1819_p1, %p41_p0  ;;  %p141_p7 = scmp.lt.s32.totalorder %s1458_s18, 3 }
   0xa   : > { %p1527_p6 = por %p134_p3, %p41_p0  ;;  %s1460_s24 = smov [#allocation5]  }
   0xb   : > { %s1822_s21 = scalar_select %p1522_p4, 1, 0 }
   0xc   : > { %s1823_s22 = scalar_select %p1527_p6, 1, 0 }
   0xd   : > { %p1532_p8 = pnand %p955_p5, %p141_p7  ;;  %s153_s25 = sshll.u32 %s1460_s24, 4  ;;  %s1536_s25 = int_to_ptr.vmem [resolvable:$true] %s153_s25 }
   0xe   : > { %s1548_s27 = sadd.s32 1, %s1458_s18   ;;  %s28_s28 = sadd.s32 1, %s1454_s17 }
   0xf   : > { %s1824_s23 = scalar_select %p1532_p8, 1, 0 }
  0x10   : > { %p1253_p9 = pneg %p1532_p8  ;;  %s25_s29 = ssub.s32 %s1458_s18, %s1548_s27 }
  0x11   : > { %s1330_s6 = scalar_lea.hbm %s1815_s1, 1024 }
  0x12   : > { %p1543_p11 = pnand %p1253_p9, %p1819_p1  ;;  %p1331_p12 = scmp.ne.s32.totalorder %s1815_s1, %s1330_s6 }
  0x13   : > { %p1337_p5 = scmp.lt.u32.totalorder %s1330_s6, %s1815_s1 }
  0x14   : > { %p1332_p13 = pneg %p1543_p11 }
  0x16   : > { %p1333_p0 = pnand %p1332_p13, %p1331_p12 }
  0x18   : > { %p1334_p3 = pneg %p1333_p0 }
  0x1a   : > { %p1339_p7 = pnand %p1337_p5, %p1334_p3 }
  0x1c   : > { %1342 = shalt.err (!%p1339_p7)
}
  0x1d   : > { %s1343_s11 = scalar_lea.vmem %s1536_s25, 1024  ;;  %p1351_p2 = scmp.lt.s32.totalorder %s1536_s25, %s1536_s25 }
  0x1e   : > { %p1344_p9 = scmp.ne.s32.totalorder %s1536_s25, %s1343_s11  ;;  %p1352_p6 = scmp.lt.s32.totalorder %s1343_s11, %s1343_s11 }
  0x20   : > { %p1346_p10 = pnand %p1344_p9, %p1332_p13  ;;  %p1353_p4 = por %p1352_p6, %p1351_p2 }
  0x22   : > { %p1347_p1 = pneg %p1346_p10 }
  0x24   : > { %p1354_p8 = pnand %p1353_p4, %p1347_p1 }
  0x26   : > { %1357 = shalt.err (!%p1354_p8)
}
  0x27   : > { %s1461_s12 = smov 64   ;;  %s1462_s13 = smov 4  }
  0x28   : > { %1256 = dma.hbm_to_vmem [thread:$0]  (!%p1543_p11), %s1815_s1, 1024, %s1536_s25, [#allocation6], %s1461_s12, %s1461_s12, %s1462_s13  }
  0x29   : > { %p26_p1 = scmp.eq.s32.totalorder %s25_s29, 0  ;;  %p35_p2 = scmp.ne.s32.totalorder %s1454_s17, %s1450_s16 }
  0x2a   : > { %p36_p4 = scmp.eq.s32.totalorder %s1458_s18, 0  ;;  %p1266_p6 = scmp.lt.s32.totalorder %s1458_s18, 2 }
  0x2b   : > { %s1582_s24 = scalar_select %p26_p1, %s1454_s17, %s28_s28  }
  0x2c   : > { %p37_p8 = por %p36_p4, %p35_p2  ;;  %p1826_p10 = scmp.eq.s32.totalorder %s1513_s19, 1 }
  0x2d   : > { %s173_s26 = sand.u32 1, %s1454_s17   ;;  %s1028_s5 = sshll.u32 %s1458_s18, 11 }
  0x2e   : > { %p1586_p12 = por %p1826_p10, %p35_p2  ;;  %s958_s6 = sshll.u32 %s173_s26, 7 }
  0x2f   : > { %s1595_s9 = scalar_lea.hbm %s1814_s0, %s1028_s5  ;;  %s177_s25 = scalar_lea.vmem [#allocation2], %s958_s6 }
  0x30   : > { %s184_s28 = sshll.u32 %s177_s25, 4  ;;  %p1597_p11 = pnand %p1266_p6, %p37_p8  ;;  %s1601_s28 = int_to_ptr.vmem [resolvable:$true] %s184_s28 }
  0x31   : > { %s1603_s10 = scalar_lea.sflag [#allocation3], %s173_s26  ;;  %s1358_s11 = scalar_lea.hbm %s1595_s9, 2048 }
  0x32   : > { %p1359_p13 = scmp.ne.s32.totalorder %s1595_s9, %s1358_s11  ;;  %p1360_p0 = pneg %p1597_p11 }
  0x33   : > { %s1363_s5 = scalar_lea.hbm %s1814_s0, 4096  ;;  %p1364_p7 = scmp.lt.u32.totalorder %s1595_s9, %s1814_s0 }
  0x34   : > { %p1361_p3 = pnand %p1360_p0, %p1359_p13  ;;  %p1365_p9 = scmp.lt.u32.totalorder %s1363_s5, %s1358_s11 }
  0x35   : > { %p1367_p2 = scmp.lt.u32.totalorder %s1358_s11, %s1595_s9 }
  0x36   : > { %p1362_p5 = pneg %p1361_p3  ;;  %p1366_p1 = por %p1365_p9, %p1364_p7 }
  0x38   : > { %p1368_p4 = por %p1367_p2, %p1366_p1 }
  0x3a   : > { %p1369_p6 = pnand %p1368_p4, %p1362_p5 }
  0x3c   : > { %1372 = shalt.err (!%p1369_p6)
}
  0x3d   : > { %s1373_s26 = scalar_lea.vmem %s1601_s28, 2048  ;;  %s1463_s8 = smov [#allocation2]  }
  0x3e   : > { %p1374_p8 = scmp.ne.s32.totalorder %s1601_s28, %s1373_s26  ;;  %s1378_s25 = sshll.u32 %s1463_s8, 4  ;;  %s1379_s25 = int_to_ptr.vmem [resolvable:$false] %s1378_s25 }
  0x3f   : > { %s1380_s14 = scalar_lea.vmem %s1379_s25, 4096  ;;  %p1381_p3 = scmp.lt.s32.totalorder %s1601_s28, %s1379_s25 }
  0x40   : > { %p1376_p10 = pnand %p1374_p8, %p1360_p0  ;;  %p1382_p7 = scmp.lt.s32.totalorder %s1380_s14, %s1373_s26 }
  0x42   : > { %p1377_p13 = pneg %p1376_p10  ;;  %p1383_p9 = por %p1382_p7, %p1381_p3 }
  0x44   : > { %p1384_p1 = pnand %p1383_p9, %p1377_p13 }
  0x46   : > { %1387 = shalt.err (!%p1384_p1)
}
  0x47   : > { %1260 = dma.hbm_to_vmem [thread:$0]  (!%p1597_p11), %s1595_s9, 2048, %s1601_s28, %s1603_s10, %s1461_s12, %s1461_s12, %s1462_s13  }
  0x48   : > { %p1829_p0 = scmp.ne.s32.totalorder %s1824_s23, 0 }
  0x49   : > { %s1637_s11 = sand.u32 (!%p1829_p0), 1, %s1450_s16   ;;  %p1830_p5 = scmp.ne.s32.totalorder (!%p1829_p0), %s1822_s21, 0 }
  0x4a   : > { %196 = sbr.rel (%p1829_p0) target bundleno = 381 (0x17d), region = 36  ;;  %s962_s20 = sshll.u32 (!%p1829_p0), %s1637_s11, 7 }
  0x4b   : > { %s199_s5 = scalar_lea.sflag (!%p1829_p0), [#allocation3], %s1637_s11  ;;  %s1643_s29 = scalar_lea.vmem (!%p1829_p0), [#allocation2], %s962_s20 }
  0x51   : > { %1433 = dma.done.wait (%p1830_p5), %s199_s5, 2048  }
  0x52   : > { %1435 = vsyncadd (%p1830_p5), %s199_s5, 4294965248  ;;  %p1831_p11 = scmp.eq.s32.totalorder %s1513_s19, 0 }
  0x54   : > { %1437 = dma.done.wait (%p1831_p11), [#allocation6], 1024   ;;  %p1832_p2 = pmov %p1831_p11 }
  0x55   : > { %v1306_v0 = vld [vmem:[#allocation5] sm:$0xff]   ;;  %v1307_v1 = vld [vmem:[#allocation5 + $0x8] sm:$0xff]   ;;  %v1308_v2 = vld [vmem:[#allocation5 + $0x10] sm:$0xff]   ;;  %s1701_s9 = scalar_lea.vmem [#allocation7], %s962_s20  ;;  %s1061_s28 = sshll.u32 %s1513_s19, 11 }
  0x56   : > { %1439 = vsyncadd (%p1832_p2), [#allocation6], 4294966272  ;;  %1181 = vmatprep.subr.bf16.mxu0 %v1306_v0  ;;  %1229 = vmatprep.subr.bf16.mxu1 %v1306_v0  ;;  %v1309_v3 = vld [vmem:[#allocation5 + $0x18] sm:$0xff]   ;;  %v1314_v4 = vld [vmem:[%s1643_s29] sm:$0xff]   ;;  %s871_s10 = sshll.u32 %s1701_s9, 4  ;;  %s1764_s19 = scalar_lea.hbm %s1818_s4, %s1061_s28  ;;  %s1766_s10 = int_to_ptr.vmem [resolvable:$true] %s871_s10 }
  0x57   : > { %1182 = vmatpush3.bf16.msra.mxu0 %v1306_v0  ;;  %1237 = vmatpush3.bf16.msra.mxu1 %v1306_v0  ;;  %v1315_v5 = vld [vmem:[%s1643_s29 + $0x40] sm:$0xff]   ;;  %v1311_v7 = vld [vmem:[#allocation5 + $0x28] sm:$0xff]   ;;  %v1312_v8 = vld [vmem:[#allocation5 + $0x30] sm:$0xff]   ;;  %s858_s26 = scalar_lea.sflag [#allocation4], %s1637_s11  ;;  %s1388_s8 = scalar_lea.vmem %s1766_s10, 2048 }
  0x58   : > { %1183 = vmatprep.subr.bf16.mxu0 %v1307_v1  ;;  %1230 = vmatprep.subr.bf16.mxu1 %v1307_v1  ;;  %v1310_v6 = vld [vmem:[#allocation5 + $0x20] sm:$0xff]   ;;  %v1313_v9 = vld [vmem:[#allocation5 + $0x38] sm:$0xff]   ;;  %v1316_v10 = vld [vmem:[%s1643_s29 + $0x8] sm:$0xff]   ;;  %p1389_p4 = scmp.ne.s32.totalorder %s1766_s10, %s1388_s8  ;;  %s1464_s25 = smov [#allocation7]  }
  0x59   : > { %1197 = vmatprep.mubr.bf16.mxu0 %v1314_v4  ;;  %1213 = vmatprep.mubr.bf16.mxu1 %v1315_v5  ;;  %v1317_v11 = vld [vmem:[%s1643_s29 + $0x48] sm:$0xff]   ;;  %v1318_v12 = vld [vmem:[%s1643_s29 + $0x10] sm:$0xff]   ;;  %v1320_v14 = vld [vmem:[%s1643_s29 + $0x18] sm:$0xff]   ;;  %s1392_s14 = sshll.u32 %s1464_s25, 4  ;;  %s1393_s14 = int_to_ptr.vmem [resolvable:$false] %s1392_s14 }
  0x5a   : > { %v1319_v13 = vld [vmem:[%s1643_s29 + $0x50] sm:$0xff]   ;;  %v1321_v15 = vld [vmem:[%s1643_s29 + $0x58] sm:$0xff]   ;;  %v1322_v16 = vld [vmem:[%s1643_s29 + $0x20] sm:$0xff]   ;;  %p1390_p6 = pnand %p1389_p4, %p1586_p12  ;;  %s1394_s20 = scalar_lea.vmem %s1393_s14, 4096 }
  0x5b   : > { %1184 = vmatpush3.bf16.msra.mxu0 %v1307_v1  ;;  %1238 = vmatpush3.bf16.msra.mxu1 %v1307_v1  ;;  %v1323_v17 = vld [vmem:[%s1643_s29 + $0x60] sm:$0xff]   ;;  %v1324_v18 = vld [vmem:[%s1643_s29 + $0x28] sm:$0xff]   ;;  %v1326_v20 = vld [vmem:[%s1643_s29 + $0x30] sm:$0xff]   ;;  %p1395_p10 = scmp.lt.s32.totalorder %s1766_s10, %s1393_s14  ;;  %p1396_p13 = scmp.lt.s32.totalorder %s1394_s20, %s1388_s8 }
  0x5c   : > { %1185 = vmatprep.subr.bf16.mxu0 %v1308_v2  ;;  %1231 = vmatprep.subr.bf16.mxu1 %v1308_v2  ;;  %v1325_v19 = vld [vmem:[%s1643_s29 + $0x68] sm:$0xff]   ;;  %v1327_v21 = vld [vmem:[%s1643_s29 + $0x70] sm:$0xff]   ;;  %v1328_v22 = vld [vmem:[%s1643_s29 + $0x38] sm:$0xff]   ;;  %p1391_p8 = pneg %p1390_p6 }
  0x5d   : > { %v1329_v23 = vld [vmem:[%s1643_s29 + $0x78] sm:$0xff]   ;;  %v1672_v24 = vld [vmem:[%s1816_s2] ss:$0 sm:$0xff]  ;;  %p1397_p3 = por %p1396_p13, %p1395_p10 }
  0x5e   : > { %v1677_v26 = vld [vmem:[%s1817_s3] ss:$0 sm:$0xff] }
  0x5f   : > { %1186 = vmatpush3.bf16.msra.mxu0 %v1308_v2  ;;  %1239 = vmatpush3.bf16.msra.mxu1 %v1308_v2  ;;  %p1398_p7 = pnand %p1397_p3, %p1391_p8 }
  0x60   : > { %1187 = vmatprep.subr.bf16.mxu0 %v1309_v3  ;;  %1232 = vmatprep.subr.bf16.mxu1 %v1309_v3 }
  0x63   : > { %1188 = vmatpush3.bf16.msra.mxu0 %v1309_v3  ;;  %1240 = vmatpush3.bf16.msra.mxu1 %v1309_v3 }
  0x64   : > { %1189 = vmatprep.subr.bf16.mxu0 %v1310_v6  ;;  %1233 = vmatprep.subr.bf16.mxu1 %v1310_v6 }
  0x67   : > { %1190 = vmatpush3.bf16.msra.mxu0 %v1310_v6  ;;  %1241 = vmatpush3.bf16.msra.mxu1 %v1310_v6 }
  0x68   : > { %1191 = vmatprep.subr.bf16.mxu0 %v1311_v7  ;;  %1234 = vmatprep.subr.bf16.mxu1 %v1311_v7 }
  0x6b   : > { %1192 = vmatpush3.bf16.msra.mxu0 %v1311_v7  ;;  %1242 = vmatpush3.bf16.msra.mxu1 %v1311_v7 }
  0x6c   : > { %1193 = vmatprep.subr.bf16.mxu0 %v1312_v8  ;;  %1235 = vmatprep.subr.bf16.mxu1 %v1312_v8 }
  0x6f   : > { %1194 = vmatpush3.bf16.msra.mxu0 %v1312_v8  ;;  %1243 = vmatpush3.bf16.msra.mxu1 %v1312_v8 }
  0x70   : > { %1195 = vmatprep.subr.bf16.mxu0 %v1313_v9  ;;  %1236 = vmatprep.subr.bf16.mxu1 %v1313_v9 }
  0x73   : > { %1196 = vmatpush3.bf16.msra.mxu0 %v1313_v9  ;;  %1244 = vmatpush3.bf16.msra.mxu1 %v1313_v9 }
  0x76   : > { %1198 = vmatmul.mubr.bf16.vlgmr.msra.gmra.mrb[0].mxu0 %v1316_v10  ;;  %1214 = vmatmul.mubr.bf16.vlgmr.msra.gmra.mrb[0].mxu1 %v1317_v11 }
  0x77   : > { %1201 = vmatprep.mubr.bf16.mxu0 %v1318_v12  ;;  %1217 = vmatprep.mubr.bf16.mxu1 %v1319_v13 }
  0x7e   : > { %1202 = vmatmul.mubr.bf16.gmra.mrb[4].mxu0 %v1320_v14  ;;  %1218 = vmatmul.mubr.bf16.gmra.mrb[4].mxu1 %v1321_v15 }
  0x7f   : > { %1205 = vmatprep.mubr.bf16.mxu0 %v1322_v16  ;;  %1221 = vmatprep.mubr.bf16.mxu1 %v1323_v17 }
  0x86   : > { %1206 = vmatmul.mubr.bf16.gmra.mrb[8].mxu0 %v1324_v18  ;;  %1222 = vmatmul.mubr.bf16.gmra.mrb[8].mxu1 %v1325_v19 }
  0x87   : > { %1209 = vmatprep.mubr.bf16.mxu0 %v1326_v20  ;;  %1225 = vmatprep.mubr.bf16.mxu1 %v1327_v21 }
  0x8e   : > { %1210 = vmatmul.mubr.bf16.gmra.mrb[12].mxu0 %v1328_v22  ;;  %1226 = vmatmul.mubr.bf16.gmra.mrb[12].mxu1 %v1329_v23 }
 0x149   : > { %v1199_v25 = vpop.f32.mrb[0].mxu0  ;;  %v1215_v27 = vpop.f32.mrb[0].mxu1 }
 0x14a   : > { %v596_v28 = vmul.f32 %v1199_v25, %v1672_v24  ;;  %v612_v29 = vmul.f32 %v1215_v27, %v1672_v24  ;;  %v460_v30 = vpop.f32.mrb[1].mxu0  ;;  %v524_v31 = vpop.f32.mrb[1].mxu1 }
 0x14b   : > { %v594_v32 = vmul.f32 %v1672_v24, %v460_v30  ;;  %v610_v33 = vmul.f32 %v1672_v24, %v524_v31  ;;  %v1200_v34 = vpop.f32.mrb[2].mxu0  ;;  %v1216_v35 = vpop.f32.mrb[2].mxu1 }
 0x14c   : > { %v635_v36 = vadd.f32 %v1677_v26, %v596_v28  ;;  %v651_v37 = vadd.f32 %v1677_v26, %v612_v29  ;;  %v597_v38 = vmul.f32 %v1200_v34, %v1672_v24  ;;  %v613_v39 = vmul.f32 %v1216_v35, %v1672_v24  ;;  %v463_v40 = vpop.f32.mrb[3].mxu0  ;;  %v527_v41 = vpop.f32.mrb[3].mxu1 }
 0x14d   : > { %v633_v42 = vadd.f32 %v1677_v26, %v594_v32  ;;  %v649_v43 = vadd.f32 %v1677_v26, %v610_v33  ;;  %v595_v44 = vmul.f32 %v1672_v24, %v463_v40  ;;  %v611_v45 = vmul.f32 %v1672_v24, %v527_v41 }
 0x14e   : > { %v636_v46 = vadd.f32 %v1677_v26, %v597_v38  ;;  %v652_v47 = vadd.f32 %v1677_v26, %v613_v39  ;;  %v667_v50 = vmax.f32 %v635_v36, 0.0  ;;  %v683_v51 = vmax.f32 %v651_v37, 0.0 }
 0x14f   : > { %v634_v48 = vadd.f32 %v1677_v26, %v595_v44  ;;  %v650_v49 = vadd.f32 %v1677_v26, %v611_v45  ;;  %v665_v54 = vmax.f32 %v633_v42, 0.0  ;;  %v681_v55 = vmax.f32 %v649_v43, 0.0 }
 0x150   : > { %v668_v52 = vmax.f32 %v636_v46, 0.0  ;;  %v684_v53 = vmax.f32 %v652_v47, 0.0 }
 0x151   : > { %v666_v56 = vmax.f32 %v634_v48, 0.0  ;;  %v682_v57 = vmax.f32 %v650_v49, 0.0  ;;  %v1203_v58 = vpop.f32.mrb[4].mxu0  ;;  %v1219_v59 = vpop.f32.mrb[4].mxu1 }
 0x152   : > { %v1070_v60 = vpack.c.bf16 %v668_v52, %v667_v50  ;;  %v1110_v61 = vpack.c.bf16 %v684_v53, %v683_v51  ;;  %v600_v62 = vmul.f32 %v1203_v58, %v1672_v24  ;;  %v616_v63 = vmul.f32 %v1219_v59, %v1672_v24  ;;  %v476_v0 = vpop.f32.mrb[5].mxu0  ;;  %v540_v1 = vpop.f32.mrb[5].mxu1 }
 0x153   : > { %v1065_v2 = vpack.c.bf16 %v666_v56, %v665_v54  ;;  %v1105_v3 = vpack.c.bf16 %v682_v57, %v681_v55  ;;  %v598_v4 = vmul.f32 %v1672_v24, %v476_v0  ;;  %v614_v5 = vmul.f32 %v1672_v24, %v540_v1  ;;  %v1204_v6 = vpop.f32.mrb[6].mxu0  ;;  %v1220_v7 = vpop.f32.mrb[6].mxu1 }
 0x154   : > { %1142 = vst [vmem:[%s1701_s9 + $0x8] sm:$0xff] %v1070_v60   ;;  %1150 = vst [vmem:[%s1701_s9 + $0x48] sm:$0xff] %v1110_v61   ;;  %v639_v8 = vadd.f32 %v1677_v26, %v600_v62  ;;  %v655_v9 = vadd.f32 %v1677_v26, %v616_v63  ;;  %v601_v10 = vmul.f32 %v1204_v6, %v1672_v24  ;;  %v479_v12 = vpop.f32.mrb[7].mxu0  ;;  %v543_v13 = vpop.f32.mrb[7].mxu1 }
 0x155   : > { %v617_v11 = vmul.f32 %v1220_v7, %v1672_v24  ;;  %1066 = vst [vmem:[%s1701_s9] sm:$0xff] %v1065_v2   ;;  %1149 = vst [vmem:[%s1701_s9 + $0x40] sm:$0xff] %v1105_v3   ;;  %v637_v14 = vadd.f32 %v1677_v26, %v598_v4  ;;  %v653_v15 = vadd.f32 %v1677_v26, %v614_v5 }
 0x156   : > { %v599_v16 = vmul.f32 %v1672_v24, %v479_v12  ;;  %v615_v17 = vmul.f32 %v1672_v24, %v543_v13  ;;  %v640_v18 = vadd.f32 %v1677_v26, %v601_v10  ;;  %v671_v22 = vmax.f32 %v639_v8, 0.0 }
 0x157   : > { %v656_v19 = vadd.f32 %v1677_v26, %v617_v11  ;;  %v687_v23 = vmax.f32 %v655_v9, 0.0  ;;  %v669_v28 = vmax.f32 %v637_v14, 0.0  ;;  %v685_v29 = vmax.f32 %v653_v15, 0.0 }
 0x158   : > { %v638_v20 = vadd.f32 %v1677_v26, %v599_v16  ;;  %v654_v21 = vadd.f32 %v1677_v26, %v615_v17  ;;  %v672_v25 = vmax.f32 %v640_v18, 0.0 }
 0x159   : > { %v688_v27 = vmax.f32 %v656_v19, 0.0  ;;  %v1207_v32 = vpop.f32.mrb[8].mxu0  ;;  %v1223_v33 = vpop.f32.mrb[8].mxu1 }
 0x15a   : > { %v670_v30 = vmax.f32 %v638_v20, 0.0  ;;  %v686_v31 = vmax.f32 %v654_v21, 0.0  ;;  %v1080_v34 = vpack.c.bf16 %v672_v25, %v671_v22  ;;  %v604_v36 = vmul.f32 %v1207_v32, %v1672_v24  ;;  %v492_v38 = vpop.f32.mrb[9].mxu0  ;;  %v556_v39 = vpop.f32.mrb[9].mxu1 }
 0x15b   : > { %v1120_v35 = vpack.c.bf16 %v688_v27, %v687_v23  ;;  %v620_v37 = vmul.f32 %v1223_v33, %v1672_v24  ;;  %v602_v42 = vmul.f32 %v1672_v24, %v492_v38  ;;  %v618_v43 = vmul.f32 %v1672_v24, %v556_v39  ;;  %v1208_v44 = vpop.f32.mrb[10].mxu0  ;;  %v1224_v45 = vpop.f32.mrb[10].mxu1 }
 0x15c   : > { %v1075_v40 = vpack.c.bf16 %v670_v30, %v669_v28  ;;  %v1115_v41 = vpack.c.bf16 %v686_v31, %v685_v29  ;;  %1144 = vst [vmem:[%s1701_s9 + $0x18] sm:$0xff] %v1080_v34   ;;  %v643_v46 = vadd.f32 %v1677_v26, %v604_v36  ;;  %v605_v48 = vmul.f32 %v1208_v44, %v1672_v24  ;;  %v495_v50 = vpop.f32.mrb[11].mxu0  ;;  %v559_v51 = vpop.f32.mrb[11].mxu1 }
 0x15d   : > { %1152 = vst [vmem:[%s1701_s9 + $0x58] sm:$0xff] %v1120_v35   ;;  %v659_v47 = vadd.f32 %v1677_v26, %v620_v37  ;;  %v621_v49 = vmul.f32 %v1224_v45, %v1672_v24  ;;  %v641_v52 = vadd.f32 %v1677_v26, %v602_v42  ;;  %v657_v53 = vadd.f32 %v1677_v26, %v618_v43 }
 0x15e   : > { %1143 = vst [vmem:[%s1701_s9 + $0x10] sm:$0xff] %v1075_v40   ;;  %1151 = vst [vmem:[%s1701_s9 + $0x50] sm:$0xff] %v1115_v41   ;;  %v603_v54 = vmul.f32 %v1672_v24, %v495_v50  ;;  %v619_v55 = vmul.f32 %v1672_v24, %v559_v51  ;;  %v644_v56 = vadd.f32 %v1677_v26, %v605_v48  ;;  %v675_v60 = vmax.f32 %v643_v46, 0.0 }
 0x15f   : > { %v660_v57 = vadd.f32 %v1677_v26, %v621_v49  ;;  %v691_v61 = vmax.f32 %v659_v47, 0.0  ;;  %v673_v0 = vmax.f32 %v641_v52, 0.0  ;;  %v689_v1 = vmax.f32 %v657_v53, 0.0 }
 0x160   : > { %v642_v58 = vadd.f32 %v1677_v26, %v603_v54  ;;  %v658_v59 = vadd.f32 %v1677_v26, %v619_v55  ;;  %v676_v62 = vmax.f32 %v644_v56, 0.0 }
 0x161   : > { %v692_v63 = vmax.f32 %v660_v57, 0.0  ;;  %v1211_v4 = vpop.f32.mrb[12].mxu0  ;;  %v1227_v5 = vpop.f32.mrb[12].mxu1 }
 0x162   : > { %v674_v2 = vmax.f32 %v642_v58, 0.0  ;;  %v690_v3 = vmax.f32 %v658_v59, 0.0  ;;  %v1090_v6 = vpack.c.bf16 %v676_v62, %v675_v60  ;;  %v608_v8 = vmul.f32 %v1211_v4, %v1672_v24  ;;  %v508_v10 = vpop.f32.mrb[13].mxu0  ;;  %v572_v11 = vpop.f32.mrb[13].mxu1 }
 0x163   : > { %v1130_v7 = vpack.c.bf16 %v692_v63, %v691_v61  ;;  %v624_v9 = vmul.f32 %v1227_v5, %v1672_v24  ;;  %v606_v14 = vmul.f32 %v1672_v24, %v508_v10  ;;  %v622_v15 = vmul.f32 %v1672_v24, %v572_v11  ;;  %v1212_v16 = vpop.f32.mrb[14].mxu0  ;;  %v1228_v17 = vpop.f32.mrb[14].mxu1 }
 0x164   : > { %v1085_v12 = vpack.c.bf16 %v674_v2, %v673_v0  ;;  %v1125_v13 = vpack.c.bf16 %v690_v3, %v689_v1  ;;  %1146 = vst [vmem:[%s1701_s9 + $0x28] sm:$0xff] %v1090_v6   ;;  %v647_v18 = vadd.f32 %v1677_v26, %v608_v8  ;;  %v609_v20 = vmul.f32 %v1212_v16, %v1672_v24  ;;  %v511_v22 = vpop.f32.mrb[15].mxu0  ;;  %v575_v23 = vpop.f32.mrb[15].mxu1 }
 0x165   : > { %1154 = vst [vmem:[%s1701_s9 + $0x68] sm:$0xff] %v1130_v7   ;;  %v663_v19 = vadd.f32 %v1677_v26, %v624_v9  ;;  %v625_v21 = vmul.f32 %v1228_v17, %v1672_v24  ;;  %v645_v25 = vadd.f32 %v1677_v26, %v606_v14  ;;  %v661_v27 = vadd.f32 %v1677_v26, %v622_v15 }
 0x166   : > { %1145 = vst [vmem:[%s1701_s9 + $0x20] sm:$0xff] %v1085_v12   ;;  %1153 = vst [vmem:[%s1701_s9 + $0x60] sm:$0xff] %v1125_v13   ;;  %v607_v28 = vmul.f32 %v1672_v24, %v511_v22  ;;  %v623_v29 = vmul.f32 %v1672_v24, %v575_v23  ;;  %v648_v30 = vadd.f32 %v1677_v26, %v609_v20  ;;  %v679_v34 = vmax.f32 %v647_v18, 0.0 }
 0x167   : > { %v664_v31 = vadd.f32 %v1677_v26, %v625_v21  ;;  %v695_v35 = vmax.f32 %v663_v19, 0.0  ;;  %v677_v24 = vmax.f32 %v645_v25, 0.0  ;;  %v693_v38 = vmax.f32 %v661_v27, 0.0 }
 0x168   : > { %v646_v32 = vadd.f32 %v1677_v26, %v607_v28  ;;  %v662_v33 = vadd.f32 %v1677_v26, %v623_v29  ;;  %v680_v36 = vmax.f32 %v648_v30, 0.0 }
 0x169   : > { %v696_v37 = vmax.f32 %v664_v31, 0.0 }
 0x16a   : > { %v678_v39 = vmax.f32 %v646_v32, 0.0  ;;  %v694_v40 = vmax.f32 %v662_v33, 0.0  ;;  %v1100_v41 = vpack.c.bf16 %v680_v36, %v679_v34 }
 0x16b   : > { %v1140_v42 = vpack.c.bf16 %v696_v37, %v695_v35 }
 0x16c   : > { %v1095_v26 = vpack.c.bf16 %v678_v39, %v677_v24  ;;  %v1135_v43 = vpack.c.bf16 %v694_v40, %v693_v38  ;;  %1148 = vst [vmem:[%s1701_s9 + $0x38] sm:$0xff] %v1100_v41  }
 0x16d   : > { %1156 = vst [vmem:[%s1701_s9 + $0x78] sm:$0xff] %v1140_v42  }
 0x16e   : > { %1147 = vst [vmem:[%s1701_s9 + $0x30] sm:$0xff] %v1095_v26   ;;  %1155 = vst [vmem:[%s1701_s9 + $0x70] sm:$0xff] %v1135_v43  }
 0x16f   : > { %1401 = shalt.err (!%p1398_p7)
}
 0x170   : > { %s1402_s5 = scalar_lea.hbm %s1764_s19, 2048  ;;  %s1406_s23 = scalar_lea.hbm %s1818_s4, 4096 }
 0x171   : > { %p1403_p9 = scmp.ne.s32.totalorder %s1764_s19, %s1402_s5  ;;  %p1407_p5 = scmp.lt.u32.totalorder %s1764_s19, %s1818_s4 }
 0x172   : > { %p1408_p11 = scmp.lt.u32.totalorder %s1406_s23, %s1402_s5  ;;  %p1410_p4 = scmp.lt.u32.totalorder %s1402_s5, %s1764_s19 }
 0x173   : > { %p1404_p1 = pnand %p1403_p9, %p1586_p12 }
 0x174   : > { %p1409_p2 = por %p1408_p11, %p1407_p5 }
 0x175   : > { %p1405_p0 = pneg %p1404_p1 }
 0x176   : > { %p1411_p6 = por %p1410_p4, %p1409_p2 }
 0x178   : > { %p1412_p8 = pnand %p1411_p6, %p1405_p0 }
 0x17a   : > { %1415 = shalt.err (!%p1412_p8)
}
 0x17b   : > { %s1465_s9 = smov 64   ;;  %s1466_s28 = smov 4  }
 0x17c   : > { %1251 = dma.vmem_to_hbm [thread:$0]  (%p1586_p12), %s1766_s10, 2048, %s1764_s19, %s858_s26, %s1465_s9, %s1465_s9, %s1466_s28  }
 0x17d PF: > { %s886_s6 = sand.u32 1, %s1446_s15   ;;  %p1833_p10 = scmp.ne.s32.totalorder %s1823_s22, 0 }
 0x17e   : > { %p1834_p13 = scmp.ge.s32.totalorder %s1458_s18, 2  ;;  %s887_s7 = scalar_lea.sflag [#allocation4], %s886_s6 }
 0x180   : > { %p1262_p3 = pnand %p1834_p13, %p1833_p10 }
 0x182   : > { %1441 = dma.done.wait (!%p1262_p3), %s887_s7, 2048  }
 0x183   : > { %1443 = vsyncadd (!%p1262_p3), %s887_s7, 4294965248  ;;  %p18_p7 = scmp.ge.s32.totalorder %s1548_s27, 4   ;;  %s1835_s15 = smov %s1450_s16 }
 0x184   : > { %s1836_s16 = smov %s1454_s17  ;;  %s1837_s17 = smov %s1582_s24 }
 0x185   : > { %s1838_s18 = smov %s1548_s27  ;;  %20 = sbr.rel (!%p18_p7) target bundleno = 6 (0x6), region = 85 }
 0x18c   :  { %892 = vsyncpa [#allocation3], 1 }
 0x18d   :  { %894 = vsyncpa [#allocation3 + $0x1], 1 }
 0x18e   :  { %895 = vsyncpa [#allocation6], 1 }
 0x18f   :  { %896 = vsyncpa [#allocation4], 1 }
 0x190   :  { %898 = vsyncpa [#allocation4 + $0x1], 1 }

</bundles_post_ra>
